<compile_context>
chip_gen: v5e
topology: v5e:2x2
jax: 0.10.0
libtpu: 0.0.40
codegen_flags: <defaults>
</compile_context>

<pallas_src>
import functools

import jax
import jax.numpy as jnp
from jax.experimental import pallas as pl
from jax.experimental.pallas import tpu as pltpu


def _round_up(x, m):
    return ((x + m - 1) // m) * m


# ---------------------------------------------------------------------------
# Chip-aware sizing helpers
# ---------------------------------------------------------------------------
def _vmem_budget_bytes():
    """Usable VMEM budget for one pallas_call (conservative, chip-aware)."""
    try:
        cap = int(pltpu.get_tpu_info().vmem_capacity_bytes)
    except Exception:
        cap = 64 * 1024 * 1024        # conservative fallback (v7x per-core VMEM)
    return max(16 * 1024 * 1024, cap // 2)


def _multi_tensorcore():
    """True on chips where a 'parallel' grid axis shards across >1 TensorCore
    (v4/v5p megacore, v7x).  v2/v3/v5e/v6e have a single TC per device, where
    splitting the batch only doubles sequential grid-step overhead."""
    try:
        kind = jax.devices()[0].device_kind.lower()
    except Exception:
        return False
    if ("lite" in kind or "v5e" in kind or "v6e" in kind
            or "v2" in kind or "v3" in kind):
        return False
    return True


def _pick_batch_tile(batch):
    if _multi_tensorcore() and batch % 16 == 0:
        return batch // 2
    return batch


def _pick_time_chunk(seq_len, b_tile, hidden_size, budget_bytes, cap=64):
    """Largest divisor of seq_len (<= cap) whose recurrence-kernel block
    footprint (double-buffered) fits the VMEM budget."""
    def footprint(tc):
        xproj = 3 * tc * b_tile * hidden_size * 2     # bf16 gate projections
        h_out = tc * b_tile * hidden_size * 2         # bf16 hidden writeback
        u_w = 3 * hidden_size * hidden_size * 2       # bf16 recurrent weights
        h0 = b_tile * hidden_size * 4                 # f32 initial hidden
        scratch = b_tile * hidden_size * 4            # f32 carried hidden
        return 2 * (xproj + h_out + u_w + h0) + scratch
    best = 1
    for tc in range(1, min(seq_len, cap) + 1):
        if seq_len % tc == 0 and footprint(tc) <= int(0.8 * budget_bytes):
            best = tc
    return best


def _plan_dim(extent, target, align):
    """Tile size + padded extent for one matmul dimension.  Prefers an
    align-multiple divisor of `extent` (no pad pass); otherwise pads."""
    if extent % align == 0:
        t = max(align, min(target, extent))
        t -= t % align
        while t > align and extent % t:
            t -= align
        return t, extent
    t = max(align, min(target, _round_up(extent, align)))
    return t, _round_up(extent, t)


# ---------------------------------------------------------------------------
# Kernel 1: fused multi-output matmul + bias (shared x block, MXU, bf16 in /
# f32 acc).  Used for (a) the per-layer input-side gate projections batched
# over ALL timesteps and (b) the decoder -- both hoisted off the serial path.
# ---------------------------------------------------------------------------
def _proj_kernel(n_out, x_ref, *refs):
    w_refs = refs[:n_out]
    b_refs = refs[n_out:2 * n_out]
    o_refs = refs[2 * n_out:]
    x = x_ref[...]
    for w_r, b_r, o_r in zip(w_refs, b_refs, o_refs):
        o_r[...] = (jnp.dot(x, w_r[...], preferred_element_type=jnp.float32)
                    + b_r[...]).astype(o_r.dtype)


def _linear_fused(x, ws, bs, *, out_dtype, tm, tn, vmem_limit):
    """out_i = x @ ws[i] + bs[i]; all outputs share the (M, K) input and N.
    Pads are skipped when shapes are already tile-aligned."""
    m, k = x.shape
    n = ws[0].shape[1]
    n_out = len(ws)

    tm, m_pad = _plan_dim(m, tm, 8)
    tn, n_pad = _plan_dim(n, tn, 128)

    x_p = x.astype(jnp.bfloat16)
    if m_pad != m:
        x_p = jnp.pad(x_p, ((0, m_pad - m), (0, 0)))
    ws_p, bs_p = [], []
    for w, b in zip(ws, bs):
        w_p = w.astype(jnp.bfloat16)
        b_p = b.astype(jnp.float32)
        if n_pad != n:
            w_p = jnp.pad(w_p, ((0, 0), (0, n_pad - n)))
            b_p = jnp.pad(b_p, ((0, 0), (0, n_pad - n)))
        ws_p.append(w_p)
        bs_p.append(b_p)

    outs = pl.pallas_call(
        functools.partial(_proj_kernel, n_out),
        grid=(m_pad // tm, n_pad // tn),
        in_specs=([pl.BlockSpec((tm, k), lambda i, j: (i, 0))]
                  + [pl.BlockSpec((k, tn), lambda i, j: (0, j))] * n_out
                  + [pl.BlockSpec((1, tn), lambda i, j: (0, j))] * n_out),
        out_specs=[pl.BlockSpec((tm, tn), lambda i, j: (i, j))] * n_out,
        out_shape=[jax.ShapeDtypeStruct((m_pad, n_pad), out_dtype)] * n_out,
        compiler_params=pltpu.CompilerParams(
            dimension_semantics=("parallel", "parallel"),
            vmem_limit_bytes=vmem_limit),
    )(x_p, *ws_p, *bs_p)
    if m_pad != m or n_pad != n:
        outs = [o[:m, :n] for o in outs]
    return list(outs)


# ---------------------------------------------------------------------------
# Kernel 2: sequential GRU recurrence for ONE layer.
# Grid = (batch_tiles, seq_len // t_chunk); batch axis "parallel", time axis
# "arbitrary".  The hidden state of the current batch tile is carried across
# time-chunk grid steps in f32 VMEM scratch.  Gate projections arrive as
# three bf16 (t_chunk, b_tile, H) blocks with the input+recurrent biases
# already folded in.
# ---------------------------------------------------------------------------
def _gru_layer_kernel(t_chunk, xr_ref, xz_ref, xh_ref, h0_ref, u_ref,
                      h_out_ref, h_scr):
    t = pl.program_id(1)

    @pl.when(t == 0)
    def _():
        h_scr[...] = h0_ref[...]

    u_r = u_ref[0]                  # (H, H) bf16, resident for the grid step
    u_z = u_ref[1]
    u_h = u_ref[2]

    def step(tc, h_prev):
        xr = xr_ref[tc].astype(jnp.float32)        # (Bt, H) whole-tile reads
        xz = xz_ref[tc].astype(jnp.float32)
        xh = xh_ref[tc].astype(jnp.float32)
        h_b = h_prev.astype(jnp.bfloat16)
        r = jax.nn.sigmoid(
            xr + jnp.dot(h_b, u_r, preferred_element_type=jnp.float32))
        z = jax.nn.sigmoid(
            xz + jnp.dot(h_b, u_z, preferred_element_type=jnp.float32))
        h_tilde = jnp.tanh(
            xh + jnp.dot((r * h_prev).astype(jnp.bfloat16), u_h,
                         preferred_element_type=jnp.float32))
        h_new = h_prev + z * (h_tilde - h_prev)
        h_out_ref[tc] = h_new.astype(h_out_ref.dtype)
        return h_new

    unroll = 2 if (t_chunk % 2 == 0 and t_chunk > 2) else 1
    h_last = jax.lax.fori_loop(0, t_chunk, step, h_scr[...], unroll=unroll)
    h_scr[...] = h_last


def _gru_layer(xr, xz, xh, h0, u3, *, t_chunk, b_tile, vmem_limit):
    seq_len, batch, hidden_size = xr.shape
    assert seq_len % t_chunk == 0 and batch % b_tile == 0
    x_spec = pl.BlockSpec((t_chunk, b_tile, hidden_size),
                          lambda b, t: (t, b, 0))
    # TODO(synk): on v7x, single-buffer the resident u3/h0 blocks
    # (pipeline_mode=pl.Buffered(1)) to reclaim VMEM once that path is robust.
    return pl.pallas_call(
        functools.partial(_gru_layer_kernel, t_chunk),
        grid=(batch // b_tile, seq_len // t_chunk),
        in_specs=[x_spec, x_spec, x_spec,
                  pl.BlockSpec((b_tile, hidden_size), lambda b, t: (b, 0)),
                  pl.BlockSpec((3, hidden_size, hidden_size),
                               lambda b, t: (0, 0, 0))],
        out_specs=pl.BlockSpec((t_chunk, b_tile, hidden_size),
                               lambda b, t: (t, b, 0)),
        out_shape=jax.ShapeDtypeStruct((seq_len, batch, hidden_size),
                                       jnp.bfloat16),
        scratch_shapes=[pltpu.VMEM((b_tile, hidden_size), jnp.float32)],
        compiler_params=pltpu.CompilerParams(
            dimension_semantics=("parallel", "arbitrary"),
            vmem_limit_bytes=vmem_limit),
    )(xr, xz, xh, h0, u3)


# ---------------------------------------------------------------------------
# One-time weight prep (hoisted out of the per-forward path)
# ---------------------------------------------------------------------------
def prepare_params(params):
    """Fold the input+recurrent biases, cast matmul weights to bf16, and stack
    the recurrent U weights.  Call once; pass the result to gru_forward."""
    num_layers = len(params["wr"])
    layers = []
    for l in range(num_layers):
        layers.append({
            "w": [params["wr"][l].astype(jnp.bfloat16),
                  params["wz"][l].astype(jnp.bfloat16),
                  params["wh"][l].astype(jnp.bfloat16)],
            "b": [(params["br"][l] + params["bur"][l]).astype(jnp.float32),
                  (params["bz"][l] + params["buz"][l]).astype(jnp.float32),
                  (params["bh"][l] + params["buh"][l]).astype(jnp.float32)],
            "u": jnp.stack([params["ur"][l], params["uz"][l],
                            params["uh"][l]]).astype(jnp.bfloat16),  # (3,H,H)
        })
    return {
        "encoder": params["encoder"],
        "dec_w": params["dec_w"].astype(jnp.bfloat16),
        "dec_b": params["dec_b"].astype(jnp.float32),
        "layers": layers,
    }


# ---------------------------------------------------------------------------
# Forward wrapper (matches models_grad.py GRU.forward: returns logits and the
# *input* hidden unchanged).
# ---------------------------------------------------------------------------
def gru_forward(inputs, hidden, prepped, *, t_chunk=None, b_tile=None):
    seq_len, batch = inputs.shape
    num_layers, _, hidden_size = hidden.shape

    budget = _vmem_budget_bytes()
    if b_tile is None:
        b_tile = _pick_batch_tile(batch)
    if t_chunk is None:
        t_chunk = _pick_time_chunk(seq_len, b_tile, hidden_size, budget)
    # Chip-aware matmul tile targets: larger M tiles when VMEM allows (128 MiB
    # chips) cut how often weight panels are re-streamed from HBM.
    tm = 512 if budget >= 48 * 1024 * 1024 else 256
    tn = 256

    # Embedding lookup is glue (plain JAX gather); matmul inputs are bf16.
    x = prepped["encoder"][inputs].reshape(seq_len * batch, -1)
    x = x.astype(jnp.bfloat16)

    for l, layer in enumerate(prepped["layers"]):
        # Input-side gate projections for ALL timesteps (off the serial path),
        # streamed in bf16 as three separate lane-dense (S, B, H) arrays.
        xr, xz, xh = _linear_fused(x, layer["w"], layer["b"],
                                   out_dtype=jnp.bfloat16,
                                   tm=tm, tn=tn, vmem_limit=budget)
        xr = xr.reshape(seq_len, batch, hidden_size)
        xz = xz.reshape(seq_len, batch, hidden_size)
        xh = xh.reshape(seq_len, batch, hidden_size)

        # Sequential recurrence: only the h-dependent matmuls remain here.
        h_seq = _gru_layer(xr, xz, xh, hidden[l], layer["u"],
                           t_chunk=t_chunk, b_tile=b_tile, vmem_limit=budget)
        x = h_seq.reshape(seq_len * batch, hidden_size)     # bf16
        # dropout(keep_prob = 1.0) == identity

    # Decoder hoisted out of the recurrence: one matmul over all timesteps.
    vocab = prepped["dec_w"].shape[1]
    logits = _linear_fused(x, [prepped["dec_w"]], [prepped["dec_b"]],
                           out_dtype=jnp.float32,
                           tm=tm, tn=tn, vmem_limit=budget)[0]
    logits = logits.reshape(seq_len, batch, vocab)

    # models_grad.py forward returns the *input* hidden unchanged.
    return logits, hidden


# ---------------------------------------------------------------------------
# Deterministic parameter init (mirrors init_weights_uniform shapes/ranges)
# ---------------------------------------------------------------------------
def init_params(key, emb_size, hidden_size, vocab_size, num_layers):
    k = (1.0 / hidden_size) ** 0.5
    keys = iter(jax.random.split(key, 12 * num_layers + 4))

    def unif(shape, bound):
        return jax.random.uniform(next(keys), shape, jnp.float32, -bound, bound)

    params = {n: [] for n in ("wr", "br", "wz", "bz", "wh", "bh",
                              "ur", "bur", "uz", "buz", "uh", "buh")}
    for l in range(num_layers):
        in_dim = emb_size if l == 0 else hidden_size
        params["wr"].append(unif((in_dim, hidden_size), k))
        params["br"].append(unif((1, hidden_size), k))
        params["wz"].append(unif((in_dim, hidden_size), k))
        params["bz"].append(unif((1, hidden_size), k))
        params["wh"].append(unif((in_dim, hidden_size), k))
        params["bh"].append(unif((1, hidden_size), k))
        params["ur"].append(unif((hidden_size, hidden_size), k))
        params["bur"].append(unif((1, hidden_size), k))
        params["uz"].append(unif((hidden_size, hidden_size), k))
        params["buz"].append(unif((1, hidden_size), k))
        params["uh"].append(unif((hidden_size, hidden_size), k))
        params["buh"].append(unif((1, hidden_size), k))

    params["encoder"] = unif((vocab_size, emb_size), 0.1)
    params["dec_w"] = unif((hidden_size, vocab_size), 0.1)
    params["dec_b"] = jnp.zeros((1, vocab_size), jnp.float32)
    return params


# ---------------------------------------------------------------------------
# Pure-JAX reference.  matmul_dtype=f32 / stream_dtype=None mirrors the
# PyTorch module (the update/bias regrouping is algebraically identical);
# matmul_dtype=bf16 / stream_dtype=bf16 mirrors the kernel's precision choices
# (bf16 MXU inputs, bf16 streaming of projections / layer outputs, f32 carry).
# ---------------------------------------------------------------------------
def gru_reference(inputs, hidden, params, *, matmul_dtype=jnp.float32,
                  stream_dtype=None):
    def mm(a, b):
        return jnp.dot(a.astype(matmul_dtype), b.astype(matmul_dtype),
                       preferred_element_type=jnp.float32)

    def stream(v):
        if stream_dtype is None:
            return v
        return v.astype(stream_dtype).astype(jnp.float32)

    emb = params["encoder"][inputs]
    seq_len = inputs.shape[0]
    num_layers = hidden.shape[0]
    h = [hidden[l] for l in range(num_layers)]
    logits = []
    for t in range(seq_len):
        x = emb[t]
        for l in range(num_layers):
            xr = stream(mm(x, params["wr"][l]) + params["br"][l]
                        + params["bur"][l])
            xz = stream(mm(x, params["wz"][l]) + params["bz"][l]
                        + params["buz"][l])
            xh = stream(mm(x, params["wh"][l]) + params["bh"][l]
                        + params["buh"][l])
            r = jax.nn.sigmoid(xr + mm(h[l], params["ur"][l]))
            z = jax.nn.sigmoid(xz + mm(h[l], params["uz"][l]))
            ht = jnp.tanh(xh + mm(r * h[l], params["uh"][l]))
            hn = h[l] + z * (ht - h[l])
            h[l] = hn
            x = stream(hn)
        logits.append(mm(x, params["dec_w"]) + params["dec_b"])
    return jnp.stack(logits, 0), hidden


if __name__ == "__main__":
    emb_size, hidden_size = 16, 32
    seq_len, batch_size = 8, 8
    vocab_size, num_layers = 64, 2
    # dp_keep_prob = 1.0  -> dropout is identity

    key = jax.random.PRNGKey(0)
    kp, ki, kh = jax.random.split(key, 3)

    params = init_params(kp, emb_size, hidden_size, vocab_size, num_layers)
    prepped = prepare_params(params)       # one-time weight prep (hoisted)
    inputs = jax.random.randint(ki, (seq_len, batch_size), 0, vocab_size,
                                jnp.int32)
    hidden = jax.random.uniform(kh, (num_layers, batch_size, hidden_size),
                                jnp.float32, -0.5, 0.5)

    logits, hid_out = gru_forward(inputs, hidden, prepped)
    logits = jax.block_until_ready(logits)
    assert logits.shape == (seq_len, batch_size, vocab_size)
    assert logits.dtype == jnp.float32

    # Tight structural check against a reference mirroring the kernel's
    # precision (bf16 MXU inputs + bf16 streaming, f32 recurrence carry).
    ref_tight, _ = gru_reference(inputs, hidden, params,
                                 matmul_dtype=jnp.bfloat16,
                                 stream_dtype=jnp.bfloat16)
    err_tight = float(jnp.max(jnp.abs(logits - ref_tight)))
    assert err_tight < 1e-2, f"tight check failed, max abs err = {err_tight}"

    # Loose semantic check against the pure-f32 (PyTorch-equivalent) reference.
    ref_f32, _ = gru_reference(inputs, hidden, params)
    err_loose = float(jnp.max(jnp.abs(logits - ref_f32)))
    assert err_loose < 8e-2, f"loose check failed, max abs err = {err_loose}"

    assert jnp.allclose(hid_out, hidden)
    print("KERNEL_OK")
</pallas_src>

<mosaic_0001>
module attributes {stable_mosaic.version = 11 : i64} {
  func.func @_proj_kernel(%arg0: i32, %arg1: i32, %arg2: memref<64x16xbf16, #tpu.memory_space<vmem>>, %arg3: memref<16x128xbf16, #tpu.memory_space<vmem>>, %arg4: memref<16x128xbf16, #tpu.memory_space<vmem>>, %arg5: memref<16x128xbf16, #tpu.memory_space<vmem>>, %arg6: memref<1x128xf32, #tpu.memory_space<vmem>>, %arg7: memref<1x128xf32, #tpu.memory_space<vmem>>, %arg8: memref<1x128xf32, #tpu.memory_space<vmem>>, %arg9: memref<64x128xbf16, #tpu.memory_space<vmem>>, %arg10: memref<64x128xbf16, #tpu.memory_space<vmem>>, %arg11: memref<64x128xbf16, #tpu.memory_space<vmem>>) attributes {dimension_semantics = [#tpu.dimension_semantics<parallel>, #tpu.dimension_semantics<parallel>], iteration_bounds = array<i64: 1, 1>, scalar_prefetch = 0 : i64, scratch_operands = 0 : i64, tpu.core_type = #tpu.core_type<tc>, window_params = [{transform_indices = @transform_0, window_bounds = array<i64: 64, 16>}, {transform_indices = @transform_1, window_bounds = array<i64: 16, 128>}, {transform_indices = @transform_2, window_bounds = array<i64: 16, 128>}, {transform_indices = @transform_3, window_bounds = array<i64: 16, 128>}, {transform_indices = @transform_4, window_bounds = array<i64: 1, 128>}, {transform_indices = @transform_5, window_bounds = array<i64: 1, 128>}, {transform_indices = @transform_6, window_bounds = array<i64: 1, 128>}, {transform_indices = @transform_7, window_bounds = array<i64: 64, 128>}, {transform_indices = @transform_8, window_bounds = array<i64: 64, 128>}, {transform_indices = @transform_9, window_bounds = array<i64: 64, 128>}]} {
    %c0 = arith.constant 0 : index
    %c0_0 = arith.constant 0 : index
    %0 = vector.load %arg2[%c0, %c0_0] : memref<64x16xbf16, #tpu.memory_space<vmem>>, vector<64x16xbf16>
    %c0_1 = arith.constant 0 : index
    %c0_2 = arith.constant 0 : index
    %1 = vector.load %arg3[%c0_1, %c0_2] : memref<16x128xbf16, #tpu.memory_space<vmem>>, vector<16x128xbf16>
    %cst = arith.constant dense<0.000000e+00> : vector<64x128xf32>
    %2 = tpu.matmul %0, %1, %cst {dimension_numbers = #tpu.dot_dimension_numbers<[1], [0], [0], [1], [0, 0, 1, 1], [], []>} : vector<64x16xbf16>, vector<16x128xbf16>, vector<64x128xf32> -> vector<64x128xf32>
    %c0_3 = arith.constant 0 : index
    %c0_4 = arith.constant 0 : index
    %3 = vector.load %arg6[%c0_3, %c0_4] : memref<1x128xf32, #tpu.memory_space<vmem>>, vector<1x128xf32>
    %4 = vector.broadcast %3 : vector<1x128xf32> to vector<64x128xf32>
    %5 = arith.addf %2, %4 : vector<64x128xf32>
    %6 = arith.truncf %5 : vector<64x128xf32> to vector<64x128xbf16>
    %c0_5 = arith.constant 0 : index
    %c0_6 = arith.constant 0 : index
    %7 = vector.load %arg9[%c0_5, %c0_6] : memref<64x128xbf16, #tpu.memory_space<vmem>>, vector<64x128xbf16>
    tpu.vector_store %arg9[%c0_5, %c0_6], %6 {strides = array<i32>} : memref<64x128xbf16, #tpu.memory_space<vmem>>, vector<64x128xbf16>,
    %c0_7 = arith.constant 0 : index
    %c0_8 = arith.constant 0 : index
    %8 = vector.load %arg4[%c0_7, %c0_8] : memref<16x128xbf16, #tpu.memory_space<vmem>>, vector<16x128xbf16>
    %cst_9 = arith.constant dense<0.000000e+00> : vector<64x128xf32>
    %9 = tpu.matmul %0, %8, %cst_9 {dimension_numbers = #tpu.dot_dimension_numbers<[1], [0], [0], [1], [0, 0, 1, 1], [], []>} : vector<64x16xbf16>, vector<16x128xbf16>, vector<64x128xf32> -> vector<64x128xf32>
    %c0_10 = arith.constant 0 : index
    %c0_11 = arith.constant 0 : index
    %10 = vector.load %arg7[%c0_10, %c0_11] : memref<1x128xf32, #tpu.memory_space<vmem>>, vector<1x128xf32>
    %11 = vector.broadcast %10 : vector<1x128xf32> to vector<64x128xf32>
    %12 = arith.addf %9, %11 : vector<64x128xf32>
    %13 = arith.truncf %12 : vector<64x128xf32> to vector<64x128xbf16>
    %c0_12 = arith.constant 0 : index
    %c0_13 = arith.constant 0 : index
    %14 = vector.load %arg10[%c0_12, %c0_13] : memref<64x128xbf16, #tpu.memory_space<vmem>>, vector<64x128xbf16>
    tpu.vector_store %arg10[%c0_12, %c0_13], %13 {strides = array<i32>} : memref<64x128xbf16, #tpu.memory_space<vmem>>, vector<64x128xbf16>,
    %c0_14 = arith.constant 0 : index
    %c0_15 = arith.constant 0 : index
    %15 = vector.load %arg5[%c0_14, %c0_15] : memref<16x128xbf16, #tpu.memory_space<vmem>>, vector<16x128xbf16>
    %cst_16 = arith.constant dense<0.000000e+00> : vector<64x128xf32>
    %16 = tpu.matmul %0, %15, %cst_16 {dimension_numbers = #tpu.dot_dimension_numbers<[1], [0], [0], [1], [0, 0, 1, 1], [], []>} : vector<64x16xbf16>, vector<16x128xbf16>, vector<64x128xf32> -> vector<64x128xf32>
    %c0_17 = arith.constant 0 : index
    %c0_18 = arith.constant 0 : index
    %17 = vector.load %arg8[%c0_17, %c0_18] : memref<1x128xf32, #tpu.memory_space<vmem>>, vector<1x128xf32>
    %18 = vector.broadcast %17 : vector<1x128xf32> to vector<64x128xf32>
    %19 = arith.addf %16, %18 : vector<64x128xf32>
    %20 = arith.truncf %19 : vector<64x128xf32> to vector<64x128xbf16>
    %c0_19 = arith.constant 0 : index
    %c0_20 = arith.constant 0 : index
    %21 = vector.load %arg11[%c0_19, %c0_20] : memref<64x128xbf16, #tpu.memory_space<vmem>>, vector<64x128xbf16>
    tpu.vector_store %arg11[%c0_19, %c0_20], %20 {strides = array<i32>} : memref<64x128xbf16, #tpu.memory_space<vmem>>, vector<64x128xbf16>,
    return
  }
  func.func @transform_0(%arg0: i32, %arg1: i32) -> (i32, i32) {
    %c0_i32 = arith.constant 0 : i32
    %c0_i32_0 = arith.constant 0 : i32
    return %arg0, %c0_i32 : i32, i32
  }
  func.func @transform_1(%arg0: i32, %arg1: i32) -> (i32, i32) {
    %c0_i32 = arith.constant 0 : i32
    %c0_i32_0 = arith.constant 0 : i32
    return %c0_i32, %arg1 : i32, i32
  }
  func.func @transform_2(%arg0: i32, %arg1: i32) -> (i32, i32) {
    %c0_i32 = arith.constant 0 : i32
    %c0_i32_0 = arith.constant 0 : i32
    return %c0_i32, %arg1 : i32, i32
  }
  func.func @transform_3(%arg0: i32, %arg1: i32) -> (i32, i32) {
    %c0_i32 = arith.constant 0 : i32
    %c0_i32_0 = arith.constant 0 : i32
    return %c0_i32, %arg1 : i32, i32
  }
  func.func @transform_4(%arg0: i32, %arg1: i32) -> (i32, i32) {
    %c0_i32 = arith.constant 0 : i32
    %c0_i32_0 = arith.constant 0 : i32
    return %c0_i32, %arg1 : i32, i32
  }
  func.func @transform_5(%arg0: i32, %arg1: i32) -> (i32, i32) {
    %c0_i32 = arith.constant 0 : i32
    %c0_i32_0 = arith.constant 0 : i32
    return %c0_i32, %arg1 : i32, i32
  }
  func.func @transform_6(%arg0: i32, %arg1: i32) -> (i32, i32) {
    %c0_i32 = arith.constant 0 : i32
    %c0_i32_0 = arith.constant 0 : i32
    return %c0_i32, %arg1 : i32, i32
  }
  func.func @transform_7(%arg0: i32, %arg1: i32) -> (i32, i32) {
    %c0_i32 = arith.constant 0 : i32
    return %arg0, %arg1 : i32, i32
  }
  func.func @transform_8(%arg0: i32, %arg1: i32) -> (i32, i32) {
    %c0_i32 = arith.constant 0 : i32
    return %arg0, %arg1 : i32, i32
  }
  func.func @transform_9(%arg0: i32, %arg1: i32) -> (i32, i32) {
    %c0_i32 = arith.constant 0 : i32
    return %arg0, %arg1 : i32, i32
  }
}

</mosaic_0001>

<bundles_post_ra>
// kernel: tpu_custom_call.1
= control target key start
LH: loop header
LB: loop body
LE: loop exit
PB: predicated region body
PF: predicated region fallthrough
CT: control target
= control target key end

     0   :  { %15 = vsyncpa [#allocation3], 0  ;;  %vm72_vm0 = vcmask 130048   ;;  %s626_s0 = inlined_call_operand.vmem [shape: bf16[64,16], index: 0, kind: input, shape index: {}]   ;;  %s627_s1 = inlined_call_operand.vmem [shape: bf16[16,128], index: 1, kind: input, shape index: {}]   ;;  %s628_s2 = inlined_call_operand.vmem [shape: bf16[16,128], index: 2, kind: input, shape index: {}]   ;;  %s629_s3 = inlined_call_operand.vmem [shape: bf16[16,128], index: 3, kind: input, shape index: {}]   ;;  %s630_s4 = inlined_call_operand.vmem [shape: f32[1,128], index: 4, kind: input, shape index: {}]   ;;  %s631_s5 = inlined_call_operand.vmem [shape: f32[1,128], index: 5, kind: input, shape index: {}]   ;;  %s632_s6 = inlined_call_operand.vmem [shape: f32[1,128], index: 6, kind: input, shape index: {}]   ;;  %s633_s7 = inlined_call_operand.hbm [shape: bf16[64,128], index: 7, kind: output, shape index: {0}]   ;;  %s634_s8 = inlined_call_operand.hbm [shape: bf16[64,128], index: 8, kind: output, shape index: {1}]   ;;  %s635_s9 = inlined_call_operand.hbm [shape: bf16[64,128], index: 9, kind: output, shape index: {2}]  }
   0x1   :  { %v341_v0 = vld [vmem:[%s627_s1] sm:$0xff]  ;;  %v338_v4 = vld [vmem:[%s626_s0 + $0x8] sm:$0xff] }
   0x2   :  { %v342_v1 = vld [vmem:[%s628_s2] sm:$0xff]  ;;  %92 = vmatpush.bf16.msra.mxu0 %v341_v0  ;;  %413 = vmatpush.bf16.msra.mxu3 %v341_v0 }
   0x3   :  { %v343_v2 = vld [vmem:[%s629_s3] sm:$0xff]  ;;  %414 = vmatpush.bf16.msra.mxu1 %v342_v1 }
   0x4   :  { %v337_v3 = vld [vmem:[%s626_s0] sm:$0xff]  ;;  %415 = vmatpush.bf16.msra.mxu2 %v343_v2 }
   0x5   :  { %16 = vsyncpa [#allocation5], 0  ;;  %317 = vmatmul.msk.bf16.vlgmr.msra.gmra.mxu0 %vm72_vm0, %v337_v3  ;;  %318 = vmatmul.msk.bf16.vlgmr.msra.gmra.mxu3 %vm72_vm0, %v338_v4  ;;  %v339_v5 = vld [vmem:[%s626_s0 + $0x10] sm:$0xff]  ;;  %v340_v6 = vld [vmem:[%s626_s0 + $0x18] sm:$0xff]  ;;  %s263_s26 = sshll.u32 %s634_s8, 4  ;;  %s501_s27 = smov [#allocation2]   ;;  %s264_s26 = int_to_ptr.hbm [resolvable:$true] %s263_s26 }
   0x6   :  { %149 = vmatpush.bf16.msrb.mxu0 %v342_v1  ;;  %326 = vmatmul.msk.bf16.vlgmr.msra.gmra.mxu1 %vm72_vm0, %v338_v4  ;;  %v591_v9 = vld [vmem:[%s630_s4] ss:$0 sm:$0xff]  ;;  %s500_s4 = smov [#allocation4]   ;;  %s248_s28 = sshll.u32 %s501_s27, 4  ;;  %s249_s28 = int_to_ptr.vmem [resolvable:$true] %s248_s28 }
   0x7   :  { %334 = vmatmul.msk.bf16.vlgmr.msra.gmra.mxu2 %vm72_vm0, %v338_v4  ;;  %v422_v10 = vld [vmem:[%s631_s5] ss:$0 sm:$0xff]  ;;  %s261_s5 = sshll.u32 %s500_s4, 4  ;;  %s250_s10 = sshll.u32 %s633_s7, 4  ;;  %s262_s5 = int_to_ptr.vmem [resolvable:$true] %s261_s5  ;;  %s251_s10 = int_to_ptr.hbm [resolvable:$true] %s250_s10 }
   0x8   :  { %v601_v20 = vld [vmem:[%s632_s6] ss:$0 sm:$0xff]  ;;  %s502_s11 = smov [#allocation6]   ;;  %s276_s8 = sshll.u32 %s635_s9, 4  ;;  %s277_s8 = int_to_ptr.hbm [resolvable:$true] %s276_s8 }
   0x9   :  { %s274_s12 = sshll.u32 %s502_s11, 4  ;;  %s503_s15 = smov 64   ;;  %s275_s12 = int_to_ptr.vmem [resolvable:$true] %s274_s12 }
   0xa   :  { %206 = vmatpush.bf16.msra.mxu0 %v343_v2  ;;  %s504_s16 = smov 4  }
  0x15   :  { %319 = vmatmul.msk.bf16.gmra.mxu3 %vm72_vm0, %v339_v5  ;;  %325 = vmatmul.msk.bf16.vlgmr.msrb.gmra.mxu0 %vm72_vm0, %v337_v3 }
  0x16   :  { %327 = vmatmul.msk.bf16.gmra.mxu1 %vm72_vm0, %v339_v5 }
  0x17   :  { %335 = vmatmul.msk.bf16.gmra.mxu2 %vm72_vm0, %v339_v5 }
  0x25   :  { %320 = vmatmul.msk.bf16.gmra.mxu3 %vm72_vm0, %v340_v6  ;;  %333 = vmatmul.msk.bf16.vlgmr.msra.gmra.mxu0 %vm72_vm0, %v337_v3 }
  0x26   :  { %328 = vmatmul.msk.bf16.gmra.mxu1 %vm72_vm0, %v340_v6 }
  0x27   :  { %336 = vmatmul.msk.bf16.gmra.mxu2 %vm72_vm0, %v340_v6 }
  0x82   :  { %v94_v7 = vpop.f32.mrf.mxu0 }
  0x83   :  { %v156_v8 = vpop.f32.mrf.mxu1  ;;  %v95_v14 = vadd.f32 %v591_v9, %v94_v7 }
  0x84   :  { %v157_v17 = vadd.f32 %v422_v10, %v156_v8 }
  0x88   :  { %v99_v11 = vpop.f32.mrf.mxu3 }
  0x89   :  { %v100_v23 = vadd.f32 %v591_v9, %v99_v11 }
  0x8a   :  { %v213_v12 = vpop.f32.mrf.mxu2  ;;  %v96_v13 = vpop.f32.mrf.mxu0 }
  0x8b   :  { %v97_v15 = vadd.f32 %v591_v9, %v96_v13  ;;  %v158_v16 = vpop.f32.mrf.mxu1  ;;  %v214_v26 = vadd.f32 %v601_v20, %v213_v12 }
  0x8c   :  { %v159_v18 = vadd.f32 %v422_v10, %v158_v16 }
  0x8d   :  { %v347_v19 = vpack.c.bf16 %v97_v15, %v95_v14 }
  0x8e   :  { %v372_v21 = vpack.c.bf16 %v159_v18, %v157_v17 }
  0x8f   :  { %348 = vst [vmem:[#allocation2] sm:$0xff] %v347_v19  }
  0x90   :  { %407 = vst [vmem:[#allocation4 + $0x8] sm:$0xff] %v372_v21   ;;  %v101_v22 = vpop.f32.mrf.mxu3 }
  0x91   :  { %v102_v24 = vadd.f32 %v591_v9, %v101_v22 }
  0x92   :  { %v215_v25 = vpop.f32.mrf.mxu2  ;;  %v151_v28 = vpop.f32.mrf.mxu0 }
  0x93   :  { %v216_v27 = vadd.f32 %v601_v20, %v215_v25  ;;  %v352_v29 = vpack.c.bf16 %v102_v24, %v100_v23  ;;  %v161_v30 = vpop.f32.mrf.mxu1  ;;  %v152_v35 = vadd.f32 %v422_v10, %v151_v28 }
  0x94   :  { %v162_v38 = vadd.f32 %v422_v10, %v161_v30 }
  0x95   :  { %v392_v31 = vpack.c.bf16 %v216_v27, %v214_v26  ;;  %404 = vst [vmem:[#allocation2 + $0x8] sm:$0xff] %v352_v29  }
  0x97   :  { %410 = vst [vmem:[#allocation6 + $0x8] sm:$0xff] %v392_v31  }
  0x98   :  { %v104_v32 = vpop.f32.mrf.mxu3 }
  0x99   :  { %v105_v43 = vadd.f32 %v591_v9, %v104_v32 }
  0x9a   :  { %v218_v33 = vpop.f32.mrf.mxu2  ;;  %v153_v34 = vpop.f32.mrf.mxu0 }
  0x9b   :  { %v154_v36 = vadd.f32 %v422_v10, %v153_v34  ;;  %v163_v37 = vpop.f32.mrf.mxu1  ;;  %v219_v46 = vadd.f32 %v601_v20, %v218_v33 }
  0x9c   :  { %v164_v39 = vadd.f32 %v422_v10, %v163_v37 }
  0x9d   :  { %v367_v40 = vpack.c.bf16 %v154_v36, %v152_v35 }
  0x9e   :  { %v377_v41 = vpack.c.bf16 %v164_v39, %v162_v38 }
  0x9f   :  { %368 = vst [vmem:[#allocation4] sm:$0xff] %v367_v40  }
  0xa0   :  { %408 = vst [vmem:[#allocation4 + $0x10] sm:$0xff] %v377_v41   ;;  %v106_v42 = vpop.f32.mrf.mxu3 }
  0xa1   :  { %v107_v44 = vadd.f32 %v591_v9, %v106_v42 }
  0xa2   :  { %v220_v45 = vpop.f32.mrf.mxu2  ;;  %v208_v48 = vpop.f32.mrf.mxu0 }
  0xa3   :  { %v221_v47 = vadd.f32 %v601_v20, %v220_v45  ;;  %v357_v49 = vpack.c.bf16 %v107_v44, %v105_v43  ;;  %v166_v50 = vpop.f32.mrf.mxu1  ;;  %v209_v55 = vadd.f32 %v601_v20, %v208_v48 }
  0xa4   :  { %v167_v58 = vadd.f32 %v422_v10, %v166_v50 }
  0xa5   :  { %v397_v51 = vpack.c.bf16 %v221_v47, %v219_v46  ;;  %405 = vst [vmem:[#allocation2 + $0x10] sm:$0xff] %v357_v49  }
  0xa7   :  { %411 = vst [vmem:[#allocation6 + $0x10] sm:$0xff] %v397_v51  }
  0xa8   :  { %v109_v52 = vpop.f32.mrf.mxu3 }
  0xa9   :  { %v110_v63 = vadd.f32 %v591_v9, %v109_v52 }
  0xaa   :  { %v223_v53 = vpop.f32.mrf.mxu2  ;;  %v210_v54 = vpop.f32.mrf.mxu0 }
  0xab   :  { %v168_v56 = vpop.f32.mrf.mxu1  ;;  %v211_v57 = vadd.f32 %v601_v20, %v210_v54  ;;  %v224_v2 = vadd.f32 %v601_v20, %v223_v53 }
  0xac   :  { %v169_v59 = vadd.f32 %v422_v10, %v168_v56 }
  0xad   :  { %v387_v60 = vpack.c.bf16 %v211_v57, %v209_v55 }
  0xae   :  { %v382_v61 = vpack.c.bf16 %v169_v59, %v167_v58 }
  0xaf   :  { %388 = vst [vmem:[#allocation6] sm:$0xff] %v387_v60  }
  0xb0   :  { %409 = vst [vmem:[#allocation4 + $0x18] sm:$0xff] %v382_v61   ;;  %v111_v62 = vpop.f32.mrf.mxu3 }
  0xb1   :  { %v112_v0 = vadd.f32 %v591_v9, %v111_v62  ;;  %269 = dma.vmem_to_hbm [thread:$0]  %s262_s5, 512, %s264_s26, [#allocation5], %s503_s15, %s503_s15, %s504_s16  }
  0xb2   :  { %v225_v1 = vpop.f32.mrf.mxu2 }
  0xb3   :  { %v226_v3 = vadd.f32 %v601_v20, %v225_v1  ;;  %v362_v4 = vpack.c.bf16 %v112_v0, %v110_v63 }
  0xb5   :  { %v402_v5 = vpack.c.bf16 %v226_v3, %v224_v2  ;;  %406 = vst [vmem:[#allocation2 + $0x18] sm:$0xff] %v362_v4  }
  0xb6   :  { %256 = dma.vmem_to_hbm [thread:$0]  %s249_s28, 512, %s251_s10, [#allocation3], %s503_s15, %s503_s15, %s504_s16  }
  0xb7   :  { %412 = vst [vmem:[#allocation6 + $0x18] sm:$0xff] %v402_v5  }
  0xb8   :  { %282 = dma.vmem_to_hbm [thread:$0]  %s275_s12, 512, %s277_s8, [#allocation5], %s503_s15, %s503_s15, %s504_s16  }
  0xb9   :  { %496 = dma.done.wait [#allocation3], 512  }
  0xba   :  { %497 = vsyncadd [#allocation3], 4294966784 }
  0xbb   :  { %498 = dma.done.wait [#allocation5], 1024  }
  0xbc   :  { %499 = vsyncadd [#allocation5], 4294966272 }
  0xbd   :  { %295 = vsyncpa [#allocation3], 1 }
  0xbe   :  { %296 = vsyncpa [#allocation5], 1 }

</bundles_post_ra>
